<compile_context>
chip_gen: v6e
topology: v6e:2x2x1
jax: 0.10.0
libtpu: 0.0.40
codegen_flags: <defaults>
</compile_context>

<pallas_src>
import math

import jax
import jax.numpy as jnp
from jax.experimental import pallas as pl
from jax.experimental.pallas import tpu as pltpu

P_LOGVAR_INIT = 0.05   # prior Normal(mu=0, logvar=0.05)
Q_LOGVAR_INIT = 0.05
HALF_LOG_2PI = 0.5 * math.log(2.0 * math.pi)


def bbb_linear_kernel(log_alpha_ref,             # SMEM (1, 1)
                      x_ref,                     # VMEM (B_pad, in_f)      block (0, 0)
                      wmu_ref, wlogvar_ref,      # VMEM (tile_out, in_f)   block (j, 0)
                      eps_w_ref,                 # VMEM (tile_out, in_f)   block (j, 0)
                      eps_out_ref, eps_s_ref,    # VMEM (B_pad, tile_out)  block (0, j)
                      out_ref,                   # VMEM (B_pad, tile_out)  block (0, j)
                      diff_ref):                 # VMEM (B_pad, tile_out)  block (0, j)
    x = x_ref[...]

    # weight = self.weight.sample() = mu + exp(0.5 * logvar) * eps
    # Native (out, in) layout slab: no transposes anywhere.
    w = wmu_ref[...] + jnp.exp(0.5 * wlogvar_ref[...]) * eps_w_ref[...]

    # Contract the shared last (in_features) dim of both operands on the MXU.
    dims = (((1,), (1,)), ((), ()))
    fc_mean = jax.lax.dot_general(x, w, dims,
                                  preferred_element_type=jnp.float32)
    fc_var = jax.lax.dot_general(x * x, w * w, dims,
                                 preferred_element_type=jnp.float32)

    # alpha hoisted out of the MXU operand (scalar * (B, tile_out) result).
    alpha = jnp.exp(log_alpha_ref[0, 0])
    fc_std = jnp.sqrt(1e-8 + alpha * fc_var)

    eps_out = eps_out_ref[...]
    eps_s = eps_s_ref[...]

    # output = mean + std * randn_like(mean)
    out_ref[...] = fc_mean + fc_std * eps_out

    # fc_qw = Normal(mu=fc_qw_mean, logvar=fc_qw_std)   (std used as logvar,
    # reproducing the reference), w_sample = mean + exp(0.5*std)*eps_s.
    w_sample = fc_mean + jnp.exp(0.5 * fc_std) * eps_s
    c = -HALF_LOG_2PI
    # (w_sample - mean)^2 / (2*exp(std)) == 0.5 * eps_s^2 exactly.
    qw_logpdf = c - 0.5 * fc_std - 0.5 * (eps_s * eps_s)
    pw_logpdf = (c - 0.5 * P_LOGVAR_INIT
                 - (w_sample * w_sample) * (0.5 * math.exp(-P_LOGVAR_INIT)))

    # Per-element KL integrand; reduced to a scalar outside the kernel over the
    # valid (un-padded) region.
    diff_ref[...] = qw_logpdf - pw_logpdf


def _round_up(v, m):
    return (v + m - 1) // m * m


def bbb_linear_forward(x, qw_mean, qw_logvar, log_alpha, eps_w, eps_out, eps_s,
                       *, tile_out=None):
    """x: (B, in_f) f32; qw_mean/qw_logvar/eps_w: (out_f, in_f) f32;
    log_alpha: (1, 1) f32; eps_out/eps_s: (B, out_f) f32.
    Returns (output (B, out_f), kl scalar)."""
    B, in_f = x.shape
    out_f = qw_mean.shape[0]

    b_pad = _round_up(max(B, 1), 8)

    # Pick a lane-dense out_features tile that keeps the double-buffered weight
    # streams well inside VMEM on every generation (v7x has only 64 MiB).
    if tile_out is None:
        stream_budget = 24 * 1024 * 1024                    # bytes
        per_col = 2 * 4 * (3 * in_f + 4 * b_pad)            # dbl-buffered bytes / out col
        t = (stream_budget // per_col) // 128 * 128
        tile_out = max(128, min(512, t))
        tile_out = min(tile_out, _round_up(out_f, 128))
    assert tile_out % 128 == 0
    out_pad = _round_up(out_f, tile_out)
    n_tiles = out_pad // tile_out

    def pad2(a, rows, cols):
        pr, pc = rows - a.shape[0], cols - a.shape[1]
        if pr == 0 and pc == 0:
            return a
        return jnp.pad(a, ((0, pr), (0, pc)))

    x_p = pad2(x, b_pad, in_f)
    wmu_p = pad2(qw_mean, out_pad, in_f)
    wlv_p = pad2(qw_logvar, out_pad, in_f)
    epsw_p = pad2(eps_w, out_pad, in_f)
    epso_p = pad2(eps_out, b_pad, out_pad)
    epss_p = pad2(eps_s, b_pad, out_pad)

    # Scoped-VMEM estimate (double buffers for every blocked operand) + margin.
    vmem_est = 4 * (2 * 3 * tile_out * in_f     # weight / eps_w streams
                    + 2 * 4 * b_pad * tile_out  # eps_out, eps_s, out, diff
                    + 2 * b_pad * in_f)         # resident x
    vmem_limit = int(min(56 * 2**20, max(32 * 2**20, vmem_est + (8 << 20))))

    w_spec = pl.BlockSpec((tile_out, in_f), lambda j: (j, 0))
    bo_spec = pl.BlockSpec((b_pad, tile_out), lambda j: (0, j))

    out_p, diff_p = pl.pallas_call(
        bbb_linear_kernel,
        grid=(n_tiles,),
        out_shape=(jax.ShapeDtypeStruct((b_pad, out_pad), jnp.float32),
                   jax.ShapeDtypeStruct((b_pad, out_pad), jnp.float32)),
        in_specs=[
            pl.BlockSpec((1, 1), lambda j: (0, 0),
                         memory_space=pltpu.MemorySpace.SMEM),   # log_alpha
            pl.BlockSpec((b_pad, in_f), lambda j: (0, 0)),       # x (resident)
            w_spec, w_spec, w_spec,                              # qw_mean/logvar/eps_w
            bo_spec, bo_spec,                                    # eps_out, eps_s
        ],
        out_specs=(bo_spec, bo_spec),
        compiler_params=pltpu.CompilerParams(
            dimension_semantics=("parallel",),
            vmem_limit_bytes=vmem_limit),
    )(log_alpha, x_p, wmu_p, wlv_p, epsw_p, epso_p, epss_p)

    out = out_p[:B, :out_f]
    kl = jnp.sum(diff_p[:B, :out_f])
    return out, kl


def _reference(x, qw_mean, qw_logvar, log_alpha, eps_w, eps_out, eps_s):
    hp = jax.lax.Precision.HIGHEST
    w = qw_mean + jnp.exp(0.5 * qw_logvar) * eps_w
    mean = jnp.dot(x, w.T, precision=hp)
    std = jnp.sqrt(1e-8 + jnp.dot(x * x, (jnp.exp(log_alpha[0, 0]) * w * w).T,
                                  precision=hp))
    output = mean + std * eps_out
    w_sample = mean + jnp.exp(0.5 * std) * eps_s
    c = -HALF_LOG_2PI
    q = c - 0.5 * std - (w_sample - mean) ** 2 / (2.0 * jnp.exp(std))
    p = c - 0.5 * P_LOGVAR_INIT - w_sample ** 2 / (2.0 * math.exp(P_LOGVAR_INIT))
    return output, jnp.sum(q - p)


if __name__ == "__main__":
    key = jax.random.PRNGKey(0)

    def run_case(B, in_f, out_f, x_scale=1.0, tile_out=None, case_id=0):
        k = jax.random.split(jax.random.fold_in(key, case_id), 6)
        stdv = 1.0 / math.sqrt(in_f)
        qw_mean = jax.random.uniform(k[0], (out_f, in_f), jnp.float32, -stdv, stdv)
        qw_logvar = jnp.full((out_f, in_f), Q_LOGVAR_INIT, jnp.float32)
        log_alpha = jax.random.uniform(k[1], (1, 1), jnp.float32, -stdv, stdv)

        x = x_scale * jax.random.normal(k[2], (B, in_f), jnp.float32)
        eps_w = jax.random.normal(k[3], (out_f, in_f), jnp.float32)
        eps_out = jax.random.normal(k[4], (B, out_f), jnp.float32)
        eps_s = jax.random.normal(k[5], (B, out_f), jnp.float32)

        out, kl = bbb_linear_forward(x, qw_mean, qw_logvar, log_alpha,
                                     eps_w, eps_out, eps_s, tile_out=tile_out)
        jax.block_until_ready((out, kl))

        out_ref, kl_ref = _reference(x, qw_mean, qw_logvar, log_alpha,
                                     eps_w, eps_out, eps_s)
        assert out.shape == (B, out_f)
        assert jnp.allclose(out, out_ref, atol=1e-3, rtol=1e-4), \
            (B, in_f, out_f, float(jnp.max(jnp.abs(out - out_ref))))
        assert jnp.allclose(kl, kl_ref, atol=5e-2, rtol=1e-3), \
            (B, in_f, out_f, float(kl), float(kl_ref))

    # Small aligned-ish case (single 128-wide tile, padded out_features).
    run_case(8, 64, 32, case_id=0)
    # Unaligned batch + out_features, multi-tile grid with padding/masking.
    run_case(5, 192, 300, x_scale=0.25, tile_out=128, case_id=1)

    print("KERNEL_OK")
</pallas_src>

<mosaic_0001>
module attributes {stable_mosaic.version = 11 : i64} {
  func.func @bbb_linear_kernel(%arg0: i32, %arg1: memref<1x1xf32, #tpu.memory_space<smem>>, %arg2: memref<8x64xf32, #tpu.memory_space<vmem>>, %arg3: memref<128x64xf32, #tpu.memory_space<vmem>>, %arg4: memref<128x64xf32, #tpu.memory_space<vmem>>, %arg5: memref<128x64xf32, #tpu.memory_space<vmem>>, %arg6: memref<8x128xf32, #tpu.memory_space<vmem>>, %arg7: memref<8x128xf32, #tpu.memory_space<vmem>>, %arg8: memref<8x128xf32, #tpu.memory_space<vmem>>, %arg9: memref<8x128xf32, #tpu.memory_space<vmem>>) attributes {dimension_semantics = [#tpu.dimension_semantics<parallel>], iteration_bounds = array<i64: 1>, scalar_prefetch = 0 : i64, scratch_operands = 0 : i64, tpu.core_type = #tpu.core_type<tc>, window_params = [{transform_indices = @transform_0, window_bounds = array<i64: 1, 1>}, {pipeline_mode = #tpu.pipeline_mode<synchronous>, transform_indices = @transform_1, window_bounds = array<i64: 8, 64>}, {transform_indices = @transform_2, window_bounds = array<i64: 128, 64>}, {transform_indices = @transform_3, window_bounds = array<i64: 128, 64>}, {transform_indices = @transform_4, window_bounds = array<i64: 128, 64>}, {transform_indices = @transform_5, window_bounds = array<i64: 8, 128>}, {transform_indices = @transform_6, window_bounds = array<i64: 8, 128>}, {transform_indices = @transform_7, window_bounds = array<i64: 8, 128>}, {transform_indices = @transform_8, window_bounds = array<i64: 8, 128>}]} {
    %c0 = arith.constant 0 : index
    %c0_0 = arith.constant 0 : index
    %0 = vector.load %arg2[%c0, %c0_0] : memref<8x64xf32, #tpu.memory_space<vmem>>, vector<8x64xf32>
    %c0_1 = arith.constant 0 : index
    %c0_2 = arith.constant 0 : index
    %1 = vector.load %arg3[%c0_1, %c0_2] : memref<128x64xf32, #tpu.memory_space<vmem>>, vector<128x64xf32>
    %c0_3 = arith.constant 0 : index
    %c0_4 = arith.constant 0 : index
    %2 = vector.load %arg4[%c0_3, %c0_4] : memref<128x64xf32, #tpu.memory_space<vmem>>, vector<128x64xf32>
    %cst = arith.constant 5.000000e-01 : f32
    %3 = vector.broadcast %cst : f32 to vector<128x64xf32>
    %4 = arith.mulf %3, %2 : vector<128x64xf32>
    %5 = math.exp %4 : vector<128x64xf32>
    %c0_5 = arith.constant 0 : index
    %c0_6 = arith.constant 0 : index
    %6 = vector.load %arg5[%c0_5, %c0_6] : memref<128x64xf32, #tpu.memory_space<vmem>>, vector<128x64xf32>
    %7 = arith.mulf %5, %6 : vector<128x64xf32>
    %8 = arith.addf %1, %7 : vector<128x64xf32>
    %cst_7 = arith.constant dense<0.000000e+00> : vector<8x128xf32>
    %9 = tpu.matmul %0, %8, %cst_7 {dimension_numbers = #tpu.dot_dimension_numbers<[1], [1], [0], [0], [0, 0, 1, 0], [], []>} : vector<8x64xf32>, vector<128x64xf32>, vector<8x128xf32> -> vector<8x128xf32>
    %10 = arith.mulf %0, %0 : vector<8x64xf32>
    %11 = arith.mulf %8, %8 : vector<128x64xf32>
    %cst_8 = arith.constant dense<0.000000e+00> : vector<8x128xf32>
    %12 = tpu.matmul %10, %11, %cst_8 {dimension_numbers = #tpu.dot_dimension_numbers<[1], [1], [0], [0], [0, 0, 1, 0], [], []>} : vector<8x64xf32>, vector<128x64xf32>, vector<8x128xf32> -> vector<8x128xf32>
    %c0_9 = arith.constant 0 : index
    %c0_10 = arith.constant 0 : index
    %13 = memref.load %arg1[%c0_9, %c0_10] : memref<1x1xf32, #tpu.memory_space<smem>>
    %14 = math.exp %13 : f32
    %15 = vector.broadcast %14 : f32 to vector<8x128xf32>
    %16 = arith.mulf %15, %12 : vector<8x128xf32>
    %cst_11 = arith.constant 9.99999993E-9 : f32
    %17 = vector.broadcast %cst_11 : f32 to vector<8x128xf32>
    %18 = arith.addf %17, %16 : vector<8x128xf32>
    %19 = math.sqrt %18 : vector<8x128xf32>
    %c0_12 = arith.constant 0 : index
    %c0_13 = arith.constant 0 : index
    %20 = vector.load %arg6[%c0_12, %c0_13] : memref<8x128xf32, #tpu.memory_space<vmem>>, vector<8x128xf32>
    %c0_14 = arith.constant 0 : index
    %c0_15 = arith.constant 0 : index
    %21 = vector.load %arg7[%c0_14, %c0_15] : memref<8x128xf32, #tpu.memory_space<vmem>>, vector<8x128xf32>
    %22 = arith.mulf %19, %20 : vector<8x128xf32>
    %23 = arith.addf %9, %22 : vector<8x128xf32>
    %c0_16 = arith.constant 0 : index
    %c0_17 = arith.constant 0 : index
    %24 = vector.load %arg8[%c0_16, %c0_17] : memref<8x128xf32, #tpu.memory_space<vmem>>, vector<8x128xf32>
    tpu.vector_store %arg8[%c0_16, %c0_17], %23 {strides = array<i32>} : memref<8x128xf32, #tpu.memory_space<vmem>>, vector<8x128xf32>,
    %cst_18 = arith.constant 5.000000e-01 : f32
    %25 = vector.broadcast %cst_18 : f32 to vector<8x128xf32>
    %26 = arith.mulf %25, %19 : vector<8x128xf32>
    %27 = math.exp %26 : vector<8x128xf32>
    %28 = arith.mulf %27, %21 : vector<8x128xf32>
    %29 = arith.addf %9, %28 : vector<8x128xf32>
    %cst_19 = arith.constant 5.000000e-01 : f32
    %30 = vector.broadcast %cst_19 : f32 to vector<8x128xf32>
    %31 = arith.mulf %30, %19 : vector<8x128xf32>
    %cst_20 = arith.constant -0.918938517 : f32
    %32 = vector.broadcast %cst_20 : f32 to vector<8x128xf32>
    %33 = arith.subf %32, %31 : vector<8x128xf32>
    %34 = arith.mulf %21, %21 : vector<8x128xf32>
    %cst_21 = arith.constant 5.000000e-01 : f32
    %35 = vector.broadcast %cst_21 : f32 to vector<8x128xf32>
    %36 = arith.mulf %35, %34 : vector<8x128xf32>
    %37 = arith.subf %33, %36 : vector<8x128xf32>
    %38 = arith.mulf %29, %29 : vector<8x128xf32>
    %cst_22 = arith.constant 0.475614727 : f32
    %39 = vector.broadcast %cst_22 : f32 to vector<8x128xf32>
    %40 = arith.mulf %38, %39 : vector<8x128xf32>
    %cst_23 = arith.constant -0.943938553 : f32
    %41 = vector.broadcast %cst_23 : f32 to vector<8x128xf32>
    %42 = arith.subf %41, %40 : vector<8x128xf32>
    %43 = arith.subf %37, %42 : vector<8x128xf32>
    %c0_24 = arith.constant 0 : index
    %c0_25 = arith.constant 0 : index
    %44 = vector.load %arg9[%c0_24, %c0_25] : memref<8x128xf32, #tpu.memory_space<vmem>>, vector<8x128xf32>
    tpu.vector_store %arg9[%c0_24, %c0_25], %43 {strides = array<i32>} : memref<8x128xf32, #tpu.memory_space<vmem>>, vector<8x128xf32>,
    return
  }
  func.func @transform_0(%arg0: i32) -> (i32, i32) {
    %c0_i32 = arith.constant 0 : i32
    %c0_i32_0 = arith.constant 0 : i32
    %c0_i32_1 = arith.constant 0 : i32
    return %c0_i32, %c0_i32_0 : i32, i32
  }
  func.func @transform_1(%arg0: i32) -> (i32, i32) {
    %c0_i32 = arith.constant 0 : i32
    %c0_i32_0 = arith.constant 0 : i32
    %c0_i32_1 = arith.constant 0 : i32
    return %c0_i32, %c0_i32_0 : i32, i32
  }
  func.func @transform_2(%arg0: i32) -> (i32, i32) {
    %c0_i32 = arith.constant 0 : i32
    %c0_i32_0 = arith.constant 0 : i32
    return %arg0, %c0_i32 : i32, i32
  }
  func.func @transform_3(%arg0: i32) -> (i32, i32) {
    %c0_i32 = arith.constant 0 : i32
    %c0_i32_0 = arith.constant 0 : i32
    return %arg0, %c0_i32 : i32, i32
  }
  func.func @transform_4(%arg0: i32) -> (i32, i32) {
    %c0_i32 = arith.constant 0 : i32
    %c0_i32_0 = arith.constant 0 : i32
    return %arg0, %c0_i32 : i32, i32
  }
  func.func @transform_5(%arg0: i32) -> (i32, i32) {
    %c0_i32 = arith.constant 0 : i32
    %c0_i32_0 = arith.constant 0 : i32
    return %c0_i32, %arg0 : i32, i32
  }
  func.func @transform_6(%arg0: i32) -> (i32, i32) {
    %c0_i32 = arith.constant 0 : i32
    %c0_i32_0 = arith.constant 0 : i32
    return %c0_i32, %arg0 : i32, i32
  }
  func.func @transform_7(%arg0: i32) -> (i32, i32) {
    %c0_i32 = arith.constant 0 : i32
    %c0_i32_0 = arith.constant 0 : i32
    return %c0_i32, %arg0 : i32, i32
  }
  func.func @transform_8(%arg0: i32) -> (i32, i32) {
    %c0_i32 = arith.constant 0 : i32
    %c0_i32_0 = arith.constant 0 : i32
    return %c0_i32, %arg0 : i32, i32
  }
}

</mosaic_0001>

<bundles_post_ra>
// kernel: tpu_custom_call.1
= control target key start
LH: loop header
LB: loop body
LE: loop exit
PB: predicated region body
PF: predicated region fallthrough
CT: control target
= control target key end

     0   :  { %15 = vsyncpa [#allocation4], 0  ;;  %v708_v2 = vmov 0.0   ;;  %vm709_vm0 = vmmov 0   ;;  %s987_s0 = inlined_call_operand.<no memory space> [shape: f32[1,1], index: 0, kind: input, shape index: {}]   ;;  %s988_s1 = inlined_call_operand.vmem [shape: f32[8,64], index: 1, kind: input, shape index: {}]   ;;  %s989_s2 = inlined_call_operand.vmem [shape: f32[128,64], index: 2, kind: input, shape index: {}]   ;;  %s990_s3 = inlined_call_operand.vmem [shape: f32[128,64], index: 3, kind: input, shape index: {}]   ;;  %s991_s4 = inlined_call_operand.vmem [shape: f32[128,64], index: 4, kind: input, shape index: {}]   ;;  %s992_s5 = inlined_call_operand.vmem [shape: f32[8,128], index: 5, kind: input, shape index: {}]   ;;  %s993_s6 = inlined_call_operand.vmem [shape: f32[8,128], index: 6, kind: input, shape index: {}]   ;;  %s994_s7 = inlined_call_operand.hbm [shape: f32[8,128], index: 7, kind: output, shape index: {0}]   ;;  %s995_s8 = inlined_call_operand.hbm [shape: f32[8,128], index: 8, kind: output, shape index: {1}]  }
   0x1   :  { %v63_v0 = vld [vmem:[%s990_s3 + $0x78] sm:$0xff]  ;;  %v421_v1 = vstv %s987_s0  ;;  %585 = vmatprep.subr.mxu1 %v708_v2  ;;  %v62_v4 = vld [vmem:[%s990_s3 + $0x70] sm:$0xff]  ;;  %550 = vmatprep.subr.mxu0 %v708_v2  ;;  %v61_v7 = vld [vmem:[%s990_s3 + $0x68] sm:$0xff] }
   0x2   :  { %v79_v3 = vmul.f32 0.5, %v63_v0  ;;  %v422_v5 = vmul.f32 1.442695, %v421_v1  ;;  %v78_v6 = vmul.f32 0.5, %v62_v4  ;;  %617 = vmatprep.mubr.msk.f32.mxu1 %vm709_vm0, %v708_v2  ;;  %582 = vmatprep.mubr.msk.f32.mxu0 %vm709_vm0, %v708_v2  ;;  %v77_v9 = vmul.f32 0.5, %v61_v7  ;;  %v60_v10 = vld [vmem:[%s990_s3 + $0x60] sm:$0xff] }
   0x3   :  { %v76_v12 = vmul.f32 0.5, %v60_v10  ;;  %v59_v13 = vld [vmem:[%s990_s3 + $0x58] sm:$0xff]  ;;  %v58_v17 = vld [vmem:[%s990_s3 + $0x50] sm:$0xff]  ;;  %v57_v20 = vld [vmem:[%s990_s3 + $0x48] sm:$0xff] }
   0x4   :  { %v110_v8 = vmul.f32 1.442695, %v79_v3  ;;  %626 = vpow2.f32 %v422_v5  ;;  %v108_v11 = vmul.f32 1.442695, %v78_v6  ;;  %v106_v14 = vmul.f32 1.442695, %v77_v9 }
   0x5   :  { %v75_v15 = vmul.f32 0.5, %v59_v13  ;;  %v104_v16 = vmul.f32 1.442695, %v76_v12  ;;  %v74_v19 = vmul.f32 0.5, %v58_v17  ;;  %v73_v22 = vmul.f32 0.5, %v57_v20  ;;  %v56_v23 = vld [vmem:[%s990_s3 + $0x40] sm:$0xff] }
   0x6   :  { %628 = vpow2.f32 %v110_v8  ;;  %v127_v25 = vld [vmem:[%s991_s4 + $0x78] sm:$0xff] }
   0x7   :  { %630 = vpow2.f32 %v108_v11  ;;  %v102_v18 = vmul.f32 1.442695, %v75_v15  ;;  %v100_v21 = vmul.f32 1.442695, %v74_v19 }
   0x8   :  { %632 = vpow2.f32 %v106_v14 }
   0x9   :  { %634 = vpow2.f32 %v104_v16 }
   0xa   :  { %636 = vpow2.f32 %v102_v18 }
  0x11   :  { %v627_v24 = vpop.eup %626 }
  0x12   :  { %16 = vsyncpa [#allocation6], 0  ;;  %v126_v26 = vld [vmem:[%s991_s4 + $0x70] sm:$0xff]  ;;  %638 = vpow2.f32 %v100_v21  ;;  %v98_v27 = vmul.f32 1.442695, %v73_v22  ;;  %v72_v28 = vmul.f32 0.5, %v56_v23  ;;  %620 = vpush %v627_v24 }
  0x13   :  { %v55_v29 = vld [vmem:[%s990_s3 + $0x38] sm:$0xff]  ;;  %v629_v30 = vpop.eup %628  ;;  %v125_v32 = vld [vmem:[%s991_s4 + $0x68] sm:$0xff]  ;;  %v46_v35 = vld [vmem:[%s989_s2 + $0x70] sm:$0xff]  ;;  %vm160_vm1 = vcmask 523264   ;;  %s710_s11 = smov [#allocation3]  }
  0x14   :  { %v47_v31 = vld [vmem:[%s989_s2 + $0x78] sm:$0xff]  ;;  %v631_v33 = vpop.eup %630  ;;  %v143_v34 = vmul.f32 %v629_v30, %v127_v25  ;;  %v71_v38 = vmul.f32 0.5, %v55_v29  ;;  %640 = vpow2.f32 %v98_v27  ;;  %v96_v41 = vmul.f32 1.442695, %v72_v28  ;;  %v54_v42 = vld [vmem:[%s990_s3 + $0x30] sm:$0xff]  ;;  %v45_v45 = vld [vmem:[%s989_s2 + $0x68] sm:$0xff] }
  0x15   :  { %v633_v36 = vpop.eup %632  ;;  %v142_v37 = vmul.f32 %v631_v33, %v126_v26  ;;  %v124_v46 = vld [vmem:[%s991_s4 + $0x60] sm:$0xff]  ;;  %v70_v49 = vmul.f32 0.5, %v54_v42  ;;  %v53_v53 = vld [vmem:[%s990_s3 + $0x28] sm:$0xff]  ;;  %v123_v56 = vld [vmem:[%s991_s4 + $0x58] sm:$0xff]  ;;  %s460_s12 = sshll.u32 %s710_s11, 4  ;;  %s461_s12 = int_to_ptr.vmem [resolvable:$true] %s460_s12 }
  0x16   :  { %v159_v39 = vadd.f32 %v143_v34, %v47_v31  ;;  %v141_v40 = vmul.f32 %v633_v36, %v125_v32  ;;  %v635_v43 = vpop.eup %634  ;;  %v94_v48 = vmul.f32 1.442695, %v71_v38  ;;  %642 = vpow2.f32 %v96_v41  ;;  %v44_v55 = vld [vmem:[%s989_s2 + $0x60] sm:$0xff]  ;;  %v43_v0 = vld [vmem:[%s989_s2 + $0x58] sm:$0xff]  ;;  %v122_v1 = vld [vmem:[%s991_s4 + $0x50] sm:$0xff]  ;;  %s664_s0 = scalar_lea.vmem %s461_s12, 128  ;;  %p669_p1 = scmp.lt.s32.totalorder %s461_s12, %s461_s12 }
  0x17   :  { %v158_v44 = vadd.f32 %v142_v37, %v46_v35  ;;  %v140_v52 = vmul.f32 %v635_v43, %v124_v46  ;;  %v637_v54 = vpop.eup %636  ;;  %v92_v57 = vmul.f32 1.442695, %v70_v49  ;;  %v69_v58 = vmul.f32 0.5, %v53_v53  ;;  %v52_v62 = vld [vmem:[%s990_s3 + $0x20] sm:$0xff]  ;;  %v51_v8 = vld [vmem:[%s990_s3 + $0x18] sm:$0xff]  ;;  %v42_v10 = vld [vmem:[%s989_s2 + $0x50] sm:$0xff]  ;;  %p665_p0 = scmp.ne.s32.totalorder %s461_s12, %s664_s0  ;;  %p670_p2 = scmp.lt.s32.totalorder %s664_s0, %s664_s0 }
  0x18   :  { %v298_v47 = vmul.f32 %v159_v39, %v159_v39  ;;  %551 = vmatpush3.xpose.msk.msra.mxu0 %vm160_vm1, %v159_v39  ;;  %v157_v51 = vadd.f32 %v141_v40, %v45_v45  ;;  %v139_v61 = vmul.f32 %v637_v54, %v123_v56  ;;  %644 = vpow2.f32 %v94_v48  ;;  %v121_v11 = vld [vmem:[%s991_s4 + $0x48] sm:$0xff]  ;;  %v50_v17 = vld [vmem:[%s990_s3 + $0x10] sm:$0xff]  ;;  %v120_v20 = vld [vmem:[%s991_s4 + $0x40] sm:$0xff] }
  0x19   :  { %552 = vmatprep.subr.mxu0 %v708_v2  ;;  %v297_v50 = vmul.f32 %v158_v44, %v158_v44  ;;  %v156_v60 = vadd.f32 %v140_v52, %v44_v55  ;;  %v90_v3 = vmul.f32 1.442695, %v69_v58  ;;  %v68_v4 = vmul.f32 0.5, %v52_v62  ;;  %v41_v19 = vld [vmem:[%s989_s2 + $0x48] sm:$0xff]  ;;  %v40_v28 = vld [vmem:[%s989_s2 + $0x40] sm:$0xff]  ;;  %v119_v29 = vld [vmem:[%s991_s4 + $0x38] sm:$0xff]  ;;  %p671_p3 = por %p670_p2, %p669_p1 }
  0x1a   :  { %586 = vmatpush3.xpose.msk.msra.mxu1 %vm160_vm1, %v298_v47  ;;  %v296_v59 = vmul.f32 %v157_v51, %v157_v51  ;;  %v155_v6 = vadd.f32 %v139_v61, %v43_v0  ;;  %646 = vpow2.f32 %v92_v57  ;;  %v67_v13 = vmul.f32 0.5, %v51_v8  ;;  %v49_v26 = vld [vmem:[%s990_s3 + $0x8] sm:$0xff]  ;;  %v48_v35 = vld [vmem:[%s990_s3] sm:$0xff]  ;;  %v39_v37 = vld [vmem:[%s989_s2 + $0x38] sm:$0xff] }
  0x1b   :  { %587 = vmatprep.subr.mxu1 %v708_v2  ;;  %v295_v5 = vmul.f32 %v156_v60, %v156_v60  ;;  %v88_v12 = vmul.f32 1.442695, %v68_v4  ;;  %648 = vpow2.f32 %v90_v3  ;;  %v66_v22 = vmul.f32 0.5, %v50_v17  ;;  %v118_v38 = vld [vmem:[%s991_s4 + $0x30] sm:$0xff]  ;;  %v117_v46 = vld [vmem:[%s991_s4 + $0x28] sm:$0xff]  ;;  %v116_v53 = vld [vmem:[%s991_s4 + $0x20] sm:$0xff]  ;;  %p672_p4 = pnand %p671_p3, %p665_p0 }
  0x1c   :  { %553 = vmatpush3.xpose.msk.msra.mxu0 %vm160_vm1, %v158_v44  ;;  %v294_v14 = vmul.f32 %v155_v6, %v155_v6  ;;  %v86_v21 = vmul.f32 1.442695, %v67_v13  ;;  %v65_v31 = vmul.f32 0.5, %v49_v26  ;;  %v64_v40 = vmul.f32 0.5, %v48_v35  ;;  %v38_v45 = vld [vmem:[%s989_s2 + $0x30] sm:$0xff]  ;;  %v37_v52 = vld [vmem:[%s989_s2 + $0x28] sm:$0xff] }
  0x1d   :  { %554 = vmatprep.subr.mxu0 %v708_v2  ;;  %650 = vpow2.f32 %v88_v12  ;;  %v84_v30 = vmul.f32 1.442695, %v66_v22  ;;  %v36_v58 = vld [vmem:[%s989_s2 + $0x20] sm:$0xff]  ;;  %v35_v0 = vld [vmem:[%s989_s2 + $0x18] sm:$0xff]  ;;  %v113_v8 = vld [vmem:[%s991_s4 + $0x8] sm:$0xff] }
  0x1e   :  { %588 = vmatpush3.xpose.msk.msra.mxu1 %vm160_vm1, %v297_v50  ;;  %652 = vpow2.f32 %v86_v21  ;;  %v82_v39 = vmul.f32 1.442695, %v65_v31  ;;  %v80_v47 = vmul.f32 1.442695, %v64_v40  ;;  %v33_v13 = vld [vmem:[%s989_s2 + $0x8] sm:$0xff]  ;;  %v31_v22 = vld [vmem:[%s988_s1] sm:$0xff] }
  0x1f   :  { %v639_v63 = vpop.eup %638  ;;  %589 = vmatprep.subr.mxu1 %v708_v2  ;;  %654 = vpow2.f32 %v84_v30 }
  0x20   :  { %555 = vmatpush3.xpose.msk.msra.mxu0 %vm160_vm1, %v157_v51  ;;  %v138_v7 = vmul.f32 %v639_v63, %v122_v1  ;;  %656 = vpow2.f32 %v82_v39  ;;  %v114_v1 = vld [vmem:[%s991_s4 + $0x10] sm:$0xff] }
  0x21   :  { %556 = vmatprep.subr.mxu0 %v708_v2  ;;  %v641_v9 = vpop.eup %640  ;;  %658 = vpow2.f32 %v80_v47 }
  0x22   :  { %590 = vmatpush3.xpose.msk.msra.mxu1 %vm160_vm1, %v296_v59  ;;  %v154_v15 = vadd.f32 %v138_v7, %v42_v10  ;;  %v137_v16 = vmul.f32 %v641_v9, %v121_v11  ;;  %v115_v59 = vld [vmem:[%s991_s4 + $0x18] sm:$0xff]  ;;  %v34_v7 = vld [vmem:[%s989_s2 + $0x10] sm:$0xff] }
  0x23   :  { %591 = vmatprep.subr.mxu1 %v708_v2  ;;  %v643_v18 = vpop.eup %642 }
  0x24   :  { %557 = vmatpush3.xpose.msk.msra.mxu0 %vm160_vm1, %v156_v60  ;;  %v293_v23 = vmul.f32 %v154_v15, %v154_v15  ;;  %v153_v24 = vadd.f32 %v137_v16, %v41_v19  ;;  %v136_v25 = vmul.f32 %v643_v18, %v120_v20  ;;  %v32_v18 = vld [vmem:[%s989_s2] sm:$0xff] }
  0x25   :  { %558 = vmatprep.subr.mxu0 %v708_v2  ;;  %v645_v27 = vpop.eup %644 }
  0x26   :  { %592 = vmatpush3.xpose.msk.msra.mxu1 %vm160_vm1, %v295_v5  ;;  %v292_v32 = vmul.f32 %v153_v24, %v153_v24  ;;  %v152_v33 = vadd.f32 %v136_v25, %v40_v28  ;;  %v135_v34 = vmul.f32 %v645_v27, %v119_v29 }
  0x27   :  { %593 = vmatprep.subr.mxu1 %v708_v2  ;;  %v647_v36 = vpop.eup %646 }
  0x28   :  { %559 = vmatpush3.xpose.msk.msra.mxu0 %vm160_vm1, %v155_v6  ;;  %v291_v41 = vmul.f32 %v152_v33, %v152_v33  ;;  %v151_v42 = vadd.f32 %v135_v34, %v39_v37  ;;  %v134_v43 = vmul.f32 %v647_v36, %v118_v38  ;;  %v649_v44 = vpop.eup %648 }
  0x29   :  { %560 = vmatprep.subr.mxu0 %v708_v2  ;;  %v133_v50 = vmul.f32 %v649_v44, %v117_v46 }
  0x2a   :  { %594 = vmatpush3.xpose.msk.msra.mxu1 %vm160_vm1, %v294_v14  ;;  %v290_v48 = vmul.f32 %v151_v42, %v151_v42  ;;  %v150_v49 = vadd.f32 %v134_v43, %v38_v45  ;;  %v651_v51 = vpop.eup %650  ;;  %v112_v14 = vld [vmem:[%s991_s4] sm:$0xff] }
  0x2b   :  { %595 = vmatprep.subr.mxu1 %v708_v2  ;;  %v149_v55 = vadd.f32 %v133_v50, %v37_v52  ;;  %v132_v56 = vmul.f32 %v651_v51, %v116_v53  ;;  %v653_v57 = vpop.eup %652 }
  0x2c   :  { %561 = vmatpush3.xpose.msk.msra.mxu0 %vm160_vm1, %v154_v15  ;;  %v289_v54 = vmul.f32 %v150_v49, %v150_v49  ;;  %v131_v62 = vmul.f32 %v653_v57, %v115_v59  ;;  %v655_v63 = vpop.eup %654 }
  0x2d   :  { %562 = vmatprep.subr.mxu0 %v708_v2  ;;  %v288_v60 = vmul.f32 %v149_v55, %v149_v55  ;;  %v148_v61 = vadd.f32 %v132_v56, %v36_v58  ;;  %v130_v5 = vmul.f32 %v655_v63, %v114_v1  ;;  %v657_v6 = vpop.eup %656 }
  0x2e   :  { %596 = vmatpush3.xpose.msk.msra.mxu1 %vm160_vm1, %v293_v23  ;;  %v147_v4 = vadd.f32 %v131_v62, %v35_v0  ;;  %v129_v11 = vmul.f32 %v657_v6, %v113_v8  ;;  %v659_v12 = vpop.eup %658  ;;  %v282_v23 = vmul.f32 %v31_v22, %v31_v22 }
  0x2f   :  { %597 = vmatprep.subr.mxu1 %v708_v2  ;;  %v287_v3 = vmul.f32 %v148_v61, %v148_v61  ;;  %v146_v10 = vadd.f32 %v130_v5, %v34_v7  ;;  %v128_v17 = vmul.f32 %v659_v12, %v112_v14 }
  0x30   :  { %563 = vmatpush3.xpose.msk.msra.mxu0 %vm160_vm1, %v153_v24  ;;  %v286_v9 = vmul.f32 %v147_v4, %v147_v4  ;;  %v145_v16 = vadd.f32 %v129_v11, %v33_v13 }
  0x31   :  { %564 = vmatprep.subr.mxu0 %v708_v2  ;;  %v285_v15 = vmul.f32 %v146_v10, %v146_v10  ;;  %v144_v20 = vadd.f32 %v128_v17, %v32_v18 }
  0x32   :  { %598 = vmatpush3.xpose.msk.msra.mxu1 %vm160_vm1, %v292_v32  ;;  %v284_v19 = vmul.f32 %v145_v16, %v145_v16 }
  0x33   :  { %599 = vmatprep.subr.mxu1 %v708_v2  ;;  %v283_v21 = vmul.f32 %v144_v20, %v144_v20 }
  0x34   :  { %565 = vmatpush3.xpose.msk.msra.mxu0 %vm160_vm1, %v152_v33  ;;  %v435_v33 = vld [vmem:[%s992_s5] sm:$0xff] }
  0x35   :  { %566 = vmatprep.subr.mxu0 %v708_v2 }
  0x36   :  { %600 = vmatpush3.xpose.msk.msra.mxu1 %vm160_vm1, %v291_v41 }
  0x37   :  { %601 = vmatprep.subr.mxu1 %v708_v2 }
  0x38   :  { %567 = vmatpush3.xpose.msk.msra.mxu0 %vm160_vm1, %v151_v42 }
  0x39   :  { %568 = vmatprep.subr.mxu0 %v708_v2 }
  0x3a   :  { %602 = vmatpush3.xpose.msk.msra.mxu1 %vm160_vm1, %v290_v48 }
  0x3b   :  { %603 = vmatprep.subr.mxu1 %v708_v2 }
  0x3c   :  { %569 = vmatpush3.xpose.msk.msra.mxu0 %vm160_vm1, %v150_v49 }
  0x3d   :  { %570 = vmatprep.subr.mxu0 %v708_v2 }
  0x3e   :  { %604 = vmatpush3.xpose.msk.msra.mxu1 %vm160_vm1, %v289_v54 }
  0x3f   :  { %605 = vmatprep.subr.mxu1 %v708_v2 }
  0x40   :  { %571 = vmatpush3.xpose.msk.msra.mxu0 %vm160_vm1, %v149_v55 }
  0x41   :  { %572 = vmatprep.subr.mxu0 %v708_v2 }
  0x42   :  { %606 = vmatpush3.xpose.msk.msra.mxu1 %vm160_vm1, %v288_v60 }
  0x43   :  { %607 = vmatprep.subr.mxu1 %v708_v2  ;;  %s621_s2 = spop %620 }
  0x44   :  { %573 = vmatpush3.xpose.msk.msra.mxu0 %vm160_vm1, %v148_v61  ;;  %v425_v24 = vstv %s621_s2 }
  0x45   :  { %574 = vmatprep.subr.mxu0 %v708_v2 }
  0x46   :  { %608 = vmatpush3.xpose.msk.msra.mxu1 %vm160_vm1, %v287_v3 }
  0x47   :  { %609 = vmatprep.subr.mxu1 %v708_v2 }
  0x48   :  { %575 = vmatpush3.xpose.msk.msra.mxu0 %vm160_vm1, %v147_v4 }
  0x49   :  { %576 = vmatprep.subr.mxu0 %v708_v2 }
  0x4a   :  { %610 = vmatpush3.xpose.msk.msra.mxu1 %vm160_vm1, %v286_v9 }
  0x4b   :  { %611 = vmatprep.subr.mxu1 %v708_v2 }
  0x4c   :  { %577 = vmatpush3.xpose.msk.msra.mxu0 %vm160_vm1, %v146_v10 }
  0x4d   :  { %578 = vmatprep.subr.mxu0 %v708_v2 }
  0x4e   :  { %612 = vmatpush3.xpose.msk.msra.mxu1 %vm160_vm1, %v285_v15 }
  0x4f   :  { %613 = vmatprep.subr.mxu1 %v708_v2 }
  0x50   :  { %579 = vmatpush3.xpose.msk.msra.mxu0 %vm160_vm1, %v145_v16 }
  0x51   :  { %580 = vmatprep.subr.mxu0 %v708_v2 }
  0x52   :  { %614 = vmatpush3.xpose.msk.msra.mxu1 %vm160_vm1, %v284_v19 }
  0x53   :  { %615 = vmatprep.subr.mxu1 %v708_v2 }
  0x54   :  { %581 = vmatpush3.xpose.msk.msra.mxu0 %vm160_vm1, %v144_v20 }
  0x56   :  { %616 = vmatpush3.xpose.msk.msra.mxu1 %vm160_vm1, %v283_v21 }
  0x57   :  { %583 = vmatmul.mubr.msk.f32.vlgmr.msra.gmra.mxu0 %vm160_vm1, %v31_v22 }
  0x59   :  { %618 = vmatmul.mubr.msk.f32.vlgmr.msra.gmra.mxu1 %vm160_vm1, %v282_v23 }
 0x117   :  { %v278_v25 = vpop.f32.mrf.mxu0 }
 0x119   :  { %v416_v26 = vpop.f32.mrf.mxu1  ;;  %v584_v27 = vpop.f32.mrf.mxu0 }
 0x11a   :  { %v426_v28 = vmul.f32 %v425_v24, %v416_v26 }
 0x11b   :  { %v619_v29 = vpop.f32.mrf.mxu1 }
 0x11c   :  { %v427_v30 = vadd.f32 1e-08, %v426_v28 }
 0x11e   :  { %660 = vrsqrt.f32 %v427_v30  ;;  %vm430_vm2 = vcmp.eq.f32.partialorder %v427_v30, inf  ;;  %v433_v32 = vand.u32 2147483648, %v427_v30  ;;  %vm432_vm3 = vcmp.eq.f32.partialorder %v427_v30, 0.0 }
 0x12b   :  { %v661_v31 = vpop.eup %660 }
 0x12c   :  { %v429_v2 = vmul.f32 %v661_v31, %v427_v30 }
 0x12e   :  { %v431_v34 = vsel %vm430_vm2, %v427_v30, %v429_v2 }
 0x12f   :  { %v434_v35 = vsel %vm432_vm3, %v433_v32, %v431_v34 }
 0x130   :  { %v440_v36 = vmul.f32 0.5, %v434_v35  ;;  %v437_v37 = vmul.f32 %v435_v33, %v434_v35 }
 0x132   :  { %v441_v38 = vmul.f32 1.442695, %v440_v36  ;;  %v438_v39 = vadd.f32 %v437_v37, %v278_v25 }
 0x134   :  { %662 = vpow2.f32 %v441_v38  ;;  %439 = vst [vmem:[#allocation3] sm:$0xff] %v438_v39 }
 0x135   :  { %675 = shalt.err (!%p672_p4)
}
 0x136   :  { %463 = dma.vmem_to_hbm [thread:$0]  %s461_s12, 128, %s994_s7, [#allocation4]   ;;  %v436_v40 = vld [vmem:[%s993_s6] sm:$0xff]  ;;  %v445_v46 = vsub.f32 -0.9189385, %v440_v36 }
 0x137   :  { %v446_v43 = vmul.f32 %v436_v40, %v436_v40  ;;  %s711_s16 = smov [#allocation5]  }
 0x138   :  { %s470_s17 = sshll.u32 %s711_s16, 4  ;;  %s471_s17 = int_to_ptr.vmem [resolvable:$true] %s470_s17 }
 0x139   :  { %v447_v47 = vmul.f32 0.5, %v446_v43  ;;  %s684_s7 = scalar_lea.vmem %s471_s17, 128  ;;  %p689_p6 = scmp.lt.s32.totalorder %s471_s17, %s471_s17 }
 0x13a   :  { %p685_p5 = scmp.ne.s32.totalorder %s471_s17, %s684_s7  ;;  %p690_p7 = scmp.lt.s32.totalorder %s684_s7, %s684_s7 }
 0x13b   :  { %v448_v50 = vsub.f32 %v445_v46, %v447_v47 }
 0x13c   :  { %p691_p8 = por %p690_p7, %p689_p6 }
 0x13e   :  { %p692_p9 = pnand %p691_p8, %p685_p5 }
 0x141   :  { %v663_v41 = vpop.eup %662 }
 0x142   :  { %v443_v42 = vmul.f32 %v663_v41, %v436_v40 }
 0x144   :  { %v444_v44 = vadd.f32 %v443_v42, %v278_v25 }
 0x146   :  { %v449_v45 = vmul.f32 %v444_v44, %v444_v44 }
 0x148   :  { %v450_v48 = vmul.f32 0.47561473, %v449_v45 }
 0x14a   :  { %v451_v49 = vsub.f32 -0.94393855, %v450_v48 }
 0x14c   :  { %v452_v51 = vsub.f32 %v448_v50, %v451_v49 }
 0x14e   :  { %453 = vst [vmem:[#allocation5] sm:$0xff] %v452_v51 }
 0x14f   :  { %695 = shalt.err (!%p692_p9)
}
 0x150   :  { %473 = dma.vmem_to_hbm [thread:$0]  %s471_s17, 128, %s995_s8, [#allocation6]  }
 0x151   :  { %704 = dma.done.wait [#allocation4], 128  }
 0x152   :  { %705 = vsyncadd [#allocation4], 4294967168 }
 0x153   :  { %706 = dma.done.wait [#allocation6], 128  }
 0x154   :  { %707 = vsyncadd [#allocation6], 4294967168 }
 0x155   :  { %480 = vsyncpa [#allocation4], 1 }
 0x156   :  { %481 = vsyncpa [#allocation6], 1 }

</bundles_post_ra>
